<compile_context>
chip_gen: v7x
topology: tpu7x:2x2x1
jax: 0.10.0
libtpu: 0.0.40
codegen_flags: <defaults>
</compile_context>

<pallas_src>
import functools

import jax
import jax.numpy as jnp
from jax.experimental import pallas as pl
from jax.experimental.pallas import tpu as pltpu

CP = 128  # padded per-channel lane width (real half / imag half each CP lanes)


def _round_up(x, m):
    return (x + m - 1) // m * m


# ----------------------------------------------------------------------------
# Kernel 1: packed complex GEMM (single bf16 MXU dot) + per-tile BN moments
# ----------------------------------------------------------------------------
def _gemm_moments_kernel(x_ref, w_ref, mom_ref):
    # (TM, Kp) bf16 @ (Kp, 2*CP) bf16 -> (TM, 2*CP) f32
    y = jnp.dot(x_ref[...], w_ref[...], preferred_element_type=jnp.float32)
    cp = y.shape[1] // 2
    yr = y[:, :cp]
    yi = y[:, cp:]
    sr = jnp.sum(yr, axis=0, keepdims=True)
    si = jnp.sum(yi, axis=0, keepdims=True)
    srr = jnp.sum(yr * yr, axis=0, keepdims=True)
    sii = jnp.sum(yi * yi, axis=0, keepdims=True)
    sri = jnp.sum(yr * yi, axis=0, keepdims=True)
    pad = jnp.zeros((3, cp), jnp.float32)
    mom_ref[0] = jnp.concatenate([sr, si, srr, sii, sri, pad], axis=0)


# ----------------------------------------------------------------------------
# Kernel 2: recompute packed GEMM + folded whitening/affine + complex LReLU
# ----------------------------------------------------------------------------
def _bn_act_kernel(x_ref, w_ref, coef_ref, out_ref):
    y = jnp.dot(x_ref[...], w_ref[...], preferred_element_type=jnp.float32)
    cp = y.shape[1] // 2
    yr = y[:, :cp]
    yi = y[:, cp:]
    c = coef_ref[...]
    a_rr = c[0:1, :cp]
    a_ir = c[0:1, cp:]
    a_ri = c[1:2, :cp]
    a_ii = c[1:2, cp:]
    offr = c[2:3, :cp]
    offi = c[2:3, cp:]
    # zr = a_rr*yr + a_ri*yi + offr ; zi = a_ir*yr + a_ii*yi + offi
    zr = a_rr * yr + a_ri * yi + offr
    zi = a_ir * yr + a_ii * yi + offi
    z = jnp.concatenate([zr, zi], axis=1)
    # complex LeakyReLU(0.2): lrelu(real) + i*lrelu(imag), applied lane-packed
    out_ref[...] = jnp.where(z >= 0.0, z, 0.2 * z)


# ----------------------------------------------------------------------------
# Glue: NHWC im2col (no big transpose) + pallas_call wrappers
# ----------------------------------------------------------------------------
def _im2col_nhwc(x_nhwc, k, stride, pad):
    """(N,H,W,C) -> (N*Ho*Wo, k*k*C) with column order (kh, kw, cin)."""
    n, h, w, c = x_nhwc.shape
    xp = jnp.pad(x_nhwc, ((0, 0), (pad, pad), (pad, pad), (0, 0)))
    ho = (h + 2 * pad - k) // stride + 1
    wo = (w + 2 * pad - k) // stride + 1
    cols = []
    for kh in range(k):
        for kw in range(k):
            cols.append(xp[:, kh:kh + stride * ho:stride,
                           kw:kw + stride * wo:stride, :])
    p = jnp.concatenate(cols, axis=-1)          # (N, Ho, Wo, k*k*C)
    return p.reshape(n * ho * wo, k * k * c), ho, wo


@functools.partial(jax.jit, static_argnames=("kernel_size", "stride", "padding"))
def encoder_block_forward(xr, xi, params, *, kernel_size, stride, padding):
    """EncoderBlock forward (bn=True, activation='lrelu').

    xr, xi : (N, Cin, H, W) float32 (real/imag planes of the complex input)
    returns: (N, Cout, Ho, Wo) complex64
    """
    n, cin, h, w = xr.shape
    wr, wi, br, bi, grr, gri, gii, betar, betai = params
    cout = wr.shape[0]
    k = kernel_size
    kdim = cin * k * k

    # ---- im2col in NHWC order (avoids the 5-D transpose copy) -------------
    pxr, ho, wo = _im2col_nhwc(xr.transpose(0, 2, 3, 1), k, stride, padding)
    pxi, _, _ = _im2col_nhwc(xi.transpose(0, 2, 3, 1), k, stride, padding)
    m = n * ho * wo

    # ---- pack [xr | xi | 1(bias col)] into one lane-dense bf16 GEMM operand
    kp = _round_up(2 * kdim + 1, 128)
    tm = min(512, _round_up(m, 128))
    m_pad = _round_up(m, tm)
    num_tiles = m_pad // tm

    xpack = jnp.concatenate([pxr, pxi, jnp.ones((m, 1), jnp.float32)], axis=1)
    xpack = jnp.pad(xpack, ((0, m_pad - m), (0, kp - (2 * kdim + 1))))
    xpack = xpack.astype(jnp.bfloat16)

    # ---- packed weight  [[wr, wi], [-wi, wr], [br, bi]]  -> (kp, 2*CP) bf16
    wr2 = wr.transpose(2, 3, 1, 0).reshape(kdim, cout)   # (kh, kw, cin) order
    wi2 = wi.transpose(2, 3, 1, 0).reshape(kdim, cout)
    wpack = jnp.zeros((kp, 2 * CP), jnp.float32)
    wpack = wpack.at[:kdim, :cout].set(wr2)
    wpack = wpack.at[kdim:2 * kdim, :cout].set(-wi2)
    wpack = wpack.at[:kdim, CP:CP + cout].set(wi2)
    wpack = wpack.at[kdim:2 * kdim, CP:CP + cout].set(wr2)
    wpack = wpack.at[2 * kdim, :cout].set(br)
    wpack = wpack.at[2 * kdim, CP:CP + cout].set(bi)
    wpack = wpack.astype(jnp.bfloat16)

    cparams = pltpu.CompilerParams(
        dimension_semantics=("parallel",),
        vmem_limit_bytes=32 * 1024 * 1024)

    # ---- pass 1: GEMM + per-tile BN moment partial sums -------------------
    mom_partial = pl.pallas_call(
        _gemm_moments_kernel,
        out_shape=jax.ShapeDtypeStruct((num_tiles, 8, CP), jnp.float32),
        grid_spec=pltpu.PrefetchScalarGridSpec(
            num_scalar_prefetch=0,
            grid=(num_tiles,),
            in_specs=[pl.BlockSpec((tm, kp), lambda i: (i, 0)),
                      pl.BlockSpec((kp, 2 * CP), lambda i: (0, 0))],
            out_specs=pl.BlockSpec((1, 8, CP), lambda i: (i, 0, 0))),
        compiler_params=cparams,
    )(xpack, wpack)

    # ---- global BN stats; fold whitening + gamma/beta into 6 channel coefs
    # (zero-padded rows of xpack contribute exactly 0 to the sums, so
    #  dividing by the true M keeps the statistics global and exact.)
    eps = 1e-5
    mom = jnp.sum(mom_partial, axis=0)        # (8, CP)
    inv_m = 1.0 / m
    mr = mom[0] * inv_m
    mi = mom[1] * inv_m
    vrr = mom[2] * inv_m - mr * mr + eps
    vii = mom[3] * inv_m - mi * mi + eps
    vri = mom[4] * inv_m - mr * mi
    delta = jnp.maximum(vrr * vii - vri * vri, 1e-20)   # guard NaN/div-by-0
    s = jnp.sqrt(delta)
    t = jnp.sqrt(vrr + vii + 2.0 * s)
    inv_st = 1.0 / (s * t)
    rrr = (vii + s) * inv_st
    rii = (vrr + s) * inv_st
    rri = -vri * inv_st

    padc = lambda v: jnp.pad(v.astype(jnp.float32), (0, CP - cout))
    grr_p, gri_p, gii_p = padc(grr), padc(gri), padc(gii)
    betar_p, betai_p = padc(betar), padc(betai)

    a_rr = grr_p * rrr + gri_p * rri
    a_ri = grr_p * rri + gri_p * rii
    a_ir = gri_p * rrr + gii_p * rri
    a_ii = gri_p * rri + gii_p * rii
    offr = betar_p - a_rr * mr - a_ri * mi
    offi = betai_p - a_ir * mr - a_ii * mi

    coef = jnp.zeros((8, 2 * CP), jnp.float32)
    coef = coef.at[0, :CP].set(a_rr)
    coef = coef.at[0, CP:].set(a_ir)
    coef = coef.at[1, :CP].set(a_ri)
    coef = coef.at[1, CP:].set(a_ii)
    coef = coef.at[2, :CP].set(offr)
    coef = coef.at[2, CP:].set(offi)

    # ---- pass 2: recompute GEMM + apply BN + complex LeakyReLU(0.2) -------
    out = pl.pallas_call(
        _bn_act_kernel,
        out_shape=jax.ShapeDtypeStruct((m_pad, 2 * CP), jnp.float32),
        grid_spec=pltpu.PrefetchScalarGridSpec(
            num_scalar_prefetch=0,
            grid=(num_tiles,),
            in_specs=[pl.BlockSpec((tm, kp), lambda i: (i, 0)),
                      pl.BlockSpec((kp, 2 * CP), lambda i: (0, 0)),
                      pl.BlockSpec((8, 2 * CP), lambda i: (0, 0))],
            out_specs=pl.BlockSpec((tm, 2 * CP), lambda i: (i, 0))),
        compiler_params=cparams,
    )(xpack, wpack, coef)

    zr = out[:m, :cout].reshape(n, ho, wo, cout).transpose(0, 3, 1, 2)
    zi = out[:m, CP:CP + cout].reshape(n, ho, wo, cout).transpose(0, 3, 1, 2)
    return jax.lax.complex(zr, zi)


# ----------------------------------------------------------------------------
# Pure-JAX reference (full f32, same math) for a sanity check
# ----------------------------------------------------------------------------
def _reference(xr, xi, params, kernel_size, stride, padding):
    n, cin, h, w = xr.shape
    wr, wi, br, bi, grr, gri, gii, betar, betai = params
    cout = wr.shape[0]
    k = kernel_size
    kdim = cin * k * k
    pxr, ho, wo = _im2col_nhwc(xr.transpose(0, 2, 3, 1), k, stride, padding)
    pxi, _, _ = _im2col_nhwc(xi.transpose(0, 2, 3, 1), k, stride, padding)
    wr2 = wr.transpose(2, 3, 1, 0).reshape(kdim, cout)
    wi2 = wi.transpose(2, 3, 1, 0).reshape(kdim, cout)
    yr = pxr @ wr2 - pxi @ wi2 + br[None, :]
    yi = pxr @ wi2 + pxi @ wr2 + bi[None, :]
    eps = 1e-5
    mr = yr.mean(0, keepdims=True)
    mi = yi.mean(0, keepdims=True)
    cr = yr - mr
    ci = yi - mi
    vrr = (cr * cr).mean(0, keepdims=True) + eps
    vii = (ci * ci).mean(0, keepdims=True) + eps
    vri = (cr * ci).mean(0, keepdims=True)
    s = jnp.sqrt(vrr * vii - vri * vri)
    t = jnp.sqrt(vrr + vii + 2.0 * s)
    inv_st = 1.0 / (s * t)
    rrr = (vii + s) * inv_st
    rii = (vrr + s) * inv_st
    rri = -vri * inv_st
    xhr = rrr * cr + rri * ci
    xhi = rri * cr + rii * ci
    zr = grr[None, :] * xhr + gri[None, :] * xhi + betar[None, :]
    zi = gri[None, :] * xhr + gii[None, :] * xhi + betai[None, :]
    zr = jnp.where(zr >= 0, zr, 0.2 * zr)
    zi = jnp.where(zi >= 0, zi, 0.2 * zi)
    zr = zr.reshape(n, ho, wo, cout).transpose(0, 3, 1, 2)
    zi = zi.reshape(n, ho, wo, cout).transpose(0, 3, 1, 2)
    return jax.lax.complex(zr, zi)


# ----------------------------------------------------------------------------
# Main
# ----------------------------------------------------------------------------
if __name__ == "__main__":
    # EncoderBlock(channel_in=4, out_channels=8, kernel_size=3, stride=2,
    #              padding=1, activation='lrelu', bn=True)
    N, Cin, H, W = 2, 4, 16, 16
    Cout, K, STRIDE, PAD = 8, 3, 2, 1

    key = jax.random.PRNGKey(0)
    k1, k2, k3, k4, k5, k6 = jax.random.split(key, 6)

    scale = 1.0 / jnp.sqrt(jnp.float32(Cin * K * K))
    wr = jax.random.normal(k1, (Cout, Cin, K, K), jnp.float32) * scale
    wi = jax.random.normal(k2, (Cout, Cin, K, K), jnp.float32) * scale
    br = jax.random.normal(k3, (Cout,), jnp.float32) * 0.1
    bi = jax.random.normal(k4, (Cout,), jnp.float32) * 0.1
    # ComplexBatchNorm2d affine params at their canonical init
    grr = jnp.full((Cout,), 1.0 / jnp.sqrt(2.0), jnp.float32)
    gii = jnp.full((Cout,), 1.0 / jnp.sqrt(2.0), jnp.float32)
    gri = jnp.zeros((Cout,), jnp.float32)
    betar = jnp.zeros((Cout,), jnp.float32)
    betai = jnp.zeros((Cout,), jnp.float32)
    params = (wr, wi, br, bi, grr, gri, gii, betar, betai)

    # complex NCHW input, split into real / imag float32 planes
    xr = jax.random.normal(k5, (N, Cin, H, W), jnp.float32)
    xi = jax.random.normal(k6, (N, Cin, H, W), jnp.float32)

    out = encoder_block_forward(xr, xi, params,
                                kernel_size=K, stride=STRIDE, padding=PAD)
    out = jax.block_until_ready(out)
    assert out.shape == (N, Cout, H // STRIDE, W // STRIDE)
    assert out.dtype == jnp.complex64

    ref = _reference(xr, xi, params, K, STRIDE, PAD)
    assert jnp.allclose(out.real, ref.real, atol=5e-2, rtol=5e-2)
    assert jnp.allclose(out.imag, ref.imag, atol=5e-2, rtol=5e-2)

    print("KERNEL_OK")
</pallas_src>

<mosaic_0001>
module attributes {stable_mosaic.version = 11 : i64} {
  func.func @_gemm_moments_kernel(%arg0: i32, %arg1: memref<128x128xbf16, #tpu.memory_space<vmem>>, %arg2: memref<128x256xbf16, #tpu.memory_space<vmem>>, %arg3: memref<1x8x128xf32, #tpu.memory_space<vmem>>) attributes {dimension_semantics = [#tpu.dimension_semantics<parallel>], iteration_bounds = array<i64: 1>, scalar_prefetch = 0 : i64, scratch_operands = 0 : i64, tpu.core_type = #tpu.core_type<tc>, window_params = [{transform_indices = @transform_0, window_bounds = array<i64: 128, 128>}, {pipeline_mode = #tpu.pipeline_mode<synchronous>, transform_indices = @transform_1, window_bounds = array<i64: 128, 256>}, {transform_indices = @transform_2, window_bounds = array<i64: 1, 8, 128>}]} {
    %c0 = arith.constant 0 : index
    %c0_0 = arith.constant 0 : index
    %0 = vector.load %arg1[%c0, %c0_0] : memref<128x128xbf16, #tpu.memory_space<vmem>>, vector<128x128xbf16>
    %c0_1 = arith.constant 0 : index
    %c0_2 = arith.constant 0 : index
    %1 = vector.load %arg2[%c0_1, %c0_2] : memref<128x256xbf16, #tpu.memory_space<vmem>>, vector<128x256xbf16>
    %cst = arith.constant dense<0.000000e+00> : vector<128x256xf32>
    %2 = tpu.matmul %0, %1, %cst {dimension_numbers = #tpu.dot_dimension_numbers<[1], [0], [0], [1], [0, 0, 1, 1], [], []>} : vector<128x128xbf16>, vector<128x256xbf16>, vector<128x256xf32> -> vector<128x256xf32>
    %3 = vector.extract_strided_slice %2 {offsets = [0, 0], sizes = [128, 128], strides = [1, 1]} : vector<128x256xf32> to vector<128x128xf32>
    %4 = vector.extract_strided_slice %2 {offsets = [0, 128], sizes = [128, 128], strides = [1, 1]} : vector<128x256xf32> to vector<128x128xf32>
    %cst_3 = arith.constant dense<0.000000e+00> : vector<128xf32>
    %5 = vector.multi_reduction <add>, %3, %cst_3 [0] : vector<128x128xf32> to vector<128xf32>
    %6 = vector.shape_cast %5 : vector<128xf32> to vector<1x128xf32>
    %cst_4 = arith.constant dense<0.000000e+00> : vector<128xf32>
    %7 = vector.multi_reduction <add>, %4, %cst_4 [0] : vector<128x128xf32> to vector<128xf32>
    %8 = vector.shape_cast %7 : vector<128xf32> to vector<1x128xf32>
    %9 = arith.mulf %3, %3 : vector<128x128xf32>
    %cst_5 = arith.constant dense<0.000000e+00> : vector<128xf32>
    %10 = vector.multi_reduction <add>, %9, %cst_5 [0] : vector<128x128xf32> to vector<128xf32>
    %11 = vector.shape_cast %10 : vector<128xf32> to vector<1x128xf32>
    %12 = arith.mulf %4, %4 : vector<128x128xf32>
    %cst_6 = arith.constant dense<0.000000e+00> : vector<128xf32>
    %13 = vector.multi_reduction <add>, %12, %cst_6 [0] : vector<128x128xf32> to vector<128xf32>
    %14 = vector.shape_cast %13 : vector<128xf32> to vector<1x128xf32>
    %15 = arith.mulf %3, %4 : vector<128x128xf32>
    %cst_7 = arith.constant dense<0.000000e+00> : vector<128xf32>
    %16 = vector.multi_reduction <add>, %15, %cst_7 [0] : vector<128x128xf32> to vector<128xf32>
    %17 = vector.shape_cast %16 : vector<128xf32> to vector<1x128xf32>
    %cst_8 = arith.constant 0.000000e+00 : f32
    %18 = vector.broadcast %cst_8 : f32 to vector<3x128xf32>
    %19 = tpu.concatenate %6, %8, %11, %14, %17, %18 in 0 : vector<1x128xf32>, vector<1x128xf32>, vector<1x128xf32>, vector<1x128xf32>, vector<1x128xf32>, vector<3x128xf32> -> vector<8x128xf32>
    %c0_9 = arith.constant 0 : index
    %c0_10 = arith.constant 0 : index
    %c0_11 = arith.constant 0 : index
    %20 = vector.load %arg3[%c0_9, %c0_10, %c0_11] : memref<1x8x128xf32, #tpu.memory_space<vmem>>, vector<1x8x128xf32>
    %21 = vector.shape_cast %20 : vector<1x8x128xf32> to vector<8x128xf32>
    %22 = vector.shape_cast %19 : vector<8x128xf32> to vector<1x8x128xf32>
    tpu.vector_store %arg3[%c0_9, %c0_10, %c0_11], %22 {strides = array<i32>} : memref<1x8x128xf32, #tpu.memory_space<vmem>>, vector<1x8x128xf32>,
    return
  }
  func.func @transform_0(%arg0: i32) -> (i32, i32) {
    %c0_i32 = arith.constant 0 : i32
    %c0_i32_0 = arith.constant 0 : i32
    return %arg0, %c0_i32 : i32, i32
  }
  func.func @transform_1(%arg0: i32) -> (i32, i32) {
    %c0_i32 = arith.constant 0 : i32
    %c0_i32_0 = arith.constant 0 : i32
    %c0_i32_1 = arith.constant 0 : i32
    return %c0_i32, %c0_i32_0 : i32, i32
  }
  func.func @transform_2(%arg0: i32) -> (i32, i32, i32) {
    %c0_i32 = arith.constant 0 : i32
    %c0_i32_0 = arith.constant 0 : i32
    %c0_i32_1 = arith.constant 0 : i32
    return %arg0, %c0_i32, %c0_i32_0 : i32, i32, i32
  }
}

module attributes {stable_mosaic.version = 11 : i64} {
  func.func @_bn_act_kernel(%arg0: i32, %arg1: memref<128x128xbf16, #tpu.memory_space<vmem>>, %arg2: memref<128x256xbf16, #tpu.memory_space<vmem>>, %arg3: memref<8x256xf32, #tpu.memory_space<vmem>>, %arg4: memref<128x256xf32, #tpu.memory_space<vmem>>) attributes {dimension_semantics = [#tpu.dimension_semantics<parallel>], iteration_bounds = array<i64: 1>, scalar_prefetch = 0 : i64, scratch_operands = 0 : i64, tpu.core_type = #tpu.core_type<tc>, window_params = [{transform_indices = @transform_0, window_bounds = array<i64: 128, 128>}, {pipeline_mode = #tpu.pipeline_mode<synchronous>, transform_indices = @transform_1, window_bounds = array<i64: 128, 256>}, {pipeline_mode = #tpu.pipeline_mode<synchronous>, transform_indices = @transform_2, window_bounds = array<i64: 8, 256>}, {transform_indices = @transform_3, window_bounds = array<i64: 128, 256>}]} {
    %c0 = arith.constant 0 : index
    %c0_0 = arith.constant 0 : index
    %0 = vector.load %arg1[%c0, %c0_0] : memref<128x128xbf16, #tpu.memory_space<vmem>>, vector<128x128xbf16>
    %c0_1 = arith.constant 0 : index
    %c0_2 = arith.constant 0 : index
    %1 = vector.load %arg2[%c0_1, %c0_2] : memref<128x256xbf16, #tpu.memory_space<vmem>>, vector<128x256xbf16>
    %cst = arith.constant dense<0.000000e+00> : vector<128x256xf32>
    %2 = tpu.matmul %0, %1, %cst {dimension_numbers = #tpu.dot_dimension_numbers<[1], [0], [0], [1], [0, 0, 1, 1], [], []>} : vector<128x128xbf16>, vector<128x256xbf16>, vector<128x256xf32> -> vector<128x256xf32>
    %3 = vector.extract_strided_slice %2 {offsets = [0, 0], sizes = [128, 128], strides = [1, 1]} : vector<128x256xf32> to vector<128x128xf32>
    %4 = vector.extract_strided_slice %2 {offsets = [0, 128], sizes = [128, 128], strides = [1, 1]} : vector<128x256xf32> to vector<128x128xf32>
    %c0_3 = arith.constant 0 : index
    %c0_4 = arith.constant 0 : index
    %5 = vector.load %arg3[%c0_3, %c0_4] : memref<8x256xf32, #tpu.memory_space<vmem>>, vector<8x256xf32>
    %6 = vector.extract_strided_slice %5 {offsets = [0, 0], sizes = [1, 128], strides = [1, 1]} : vector<8x256xf32> to vector<1x128xf32>
    %7 = vector.extract_strided_slice %5 {offsets = [0, 128], sizes = [1, 128], strides = [1, 1]} : vector<8x256xf32> to vector<1x128xf32>
    %8 = vector.extract_strided_slice %5 {offsets = [1, 0], sizes = [1, 128], strides = [1, 1]} : vector<8x256xf32> to vector<1x128xf32>
    %9 = vector.extract_strided_slice %5 {offsets = [1, 128], sizes = [1, 128], strides = [1, 1]} : vector<8x256xf32> to vector<1x128xf32>
    %10 = vector.extract_strided_slice %5 {offsets = [2, 0], sizes = [1, 128], strides = [1, 1]} : vector<8x256xf32> to vector<1x128xf32>
    %11 = vector.extract_strided_slice %5 {offsets = [2, 128], sizes = [1, 128], strides = [1, 1]} : vector<8x256xf32> to vector<1x128xf32>
    %12 = vector.broadcast %6 : vector<1x128xf32> to vector<128x128xf32>
    %13 = arith.mulf %12, %3 : vector<128x128xf32>
    %14 = vector.broadcast %8 : vector<1x128xf32> to vector<128x128xf32>
    %15 = arith.mulf %14, %4 : vector<128x128xf32>
    %16 = arith.addf %13, %15 : vector<128x128xf32>
    %17 = vector.broadcast %10 : vector<1x128xf32> to vector<128x128xf32>
    %18 = arith.addf %16, %17 : vector<128x128xf32>
    %19 = vector.broadcast %7 : vector<1x128xf32> to vector<128x128xf32>
    %20 = arith.mulf %19, %3 : vector<128x128xf32>
    %21 = vector.broadcast %9 : vector<1x128xf32> to vector<128x128xf32>
    %22 = arith.mulf %21, %4 : vector<128x128xf32>
    %23 = arith.addf %20, %22 : vector<128x128xf32>
    %24 = vector.broadcast %11 : vector<1x128xf32> to vector<128x128xf32>
    %25 = arith.addf %23, %24 : vector<128x128xf32>
    %26 = tpu.concatenate %18, %25 in 1 : vector<128x128xf32>, vector<128x128xf32> -> vector<128x256xf32>
    %cst_5 = arith.constant 0.000000e+00 : f32
    %27 = vector.broadcast %cst_5 : f32 to vector<128x256xf32>
    %28 = arith.cmpf oge, %26, %27 : vector<128x256xf32>
    %cst_6 = arith.constant 2.000000e-01 : f32
    %29 = vector.broadcast %cst_6 : f32 to vector<128x256xf32>
    %30 = arith.mulf %29, %26 : vector<128x256xf32>
    %31 = arith.select %28, %26, %30 : vector<128x256xi1>, vector<128x256xf32>
    %c0_7 = arith.constant 0 : index
    %c0_8 = arith.constant 0 : index
    %32 = vector.load %arg4[%c0_7, %c0_8] : memref<128x256xf32, #tpu.memory_space<vmem>>, vector<128x256xf32>
    tpu.vector_store %arg4[%c0_7, %c0_8], %31 {strides = array<i32>} : memref<128x256xf32, #tpu.memory_space<vmem>>, vector<128x256xf32>,
    return
  }
  func.func @transform_0(%arg0: i32) -> (i32, i32) {
    %c0_i32 = arith.constant 0 : i32
    %c0_i32_0 = arith.constant 0 : i32
    return %arg0, %c0_i32 : i32, i32
  }
  func.func @transform_1(%arg0: i32) -> (i32, i32) {
    %c0_i32 = arith.constant 0 : i32
    %c0_i32_0 = arith.constant 0 : i32
    %c0_i32_1 = arith.constant 0 : i32
    return %c0_i32, %c0_i32_0 : i32, i32
  }
  func.func @transform_2(%arg0: i32) -> (i32, i32) {
    %c0_i32 = arith.constant 0 : i32
    %c0_i32_0 = arith.constant 0 : i32
    %c0_i32_1 = arith.constant 0 : i32
    return %c0_i32, %c0_i32_0 : i32, i32
  }
  func.func @transform_3(%arg0: i32) -> (i32, i32) {
    %c0_i32 = arith.constant 0 : i32
    %c0_i32_0 = arith.constant 0 : i32
    return %arg0, %c0_i32 : i32, i32
  }
}

</mosaic_0001>

<bundles_post_ra>
// kernel: neg.2
= control target key start
LH: loop header
LB: loop body
LE: loop exit
PB: predicated region body
PF: predicated region fallthrough
CT: control target
= control target key end

     0   :  { %v65_v12 = vmov 0.0   ;;  %s100_s0 = inlined_call_operand.vmem [shape: f32[36,8], index: 0, kind: input, shape index: {}]   ;;  %s101_s1 = inlined_call_operand.vmem [shape: bf16[36,8], index: 1, kind: output, shape index: {}]  }
   0x1   :  { %v2_v0 = vld [vmem:[%s100_s0] sm:$0xff]  ;;  %v45_v1 = vld [vmem:[%s100_s0 + $0x8] sm:$0xff]  ;;  %v47_v2 = vld [vmem:[%s100_s0 + $0x10] sm:$0xff] }
   0x2   :  { %v5_v3 = vxor.u32 2147483648, %v2_v0  ;;  %v13_v4 = vxor.u32 2147483648, %v45_v1  ;;  %v22_v5 = vxor.u32 2147483648, %v47_v2  ;;  %v49_v6 = vld [vmem:[%s100_s0 + $0x18] sm:$0xff]  ;;  %v51_v7 = vld [vmem:[%s100_s0 + $0x20] sm:$0xff] }
   0x3   :  { %v31_v8 = vxor.u32 2147483648, %v49_v6  ;;  %v40_v9 = vxor.u32 2147483648, %v51_v7 }
   0x4   :  { %v56_v10 = vpack.c.bf16 %v13_v4, %v5_v3 }
   0x5   :  { %v61_v11 = vpack.c.bf16 %v31_v8, %v22_v5  ;;  %v43_v13 = vpack.c.bf16 %v65_v12, %v40_v9 }
   0x6   :  { %57 = vst [vmem:[%s101_s1] sm:$0xff] %v56_v10  }
   0x7   :  { %63 = vst [vmem:[%s101_s1 + $0x8] sm:$0xff] %v61_v11   ;;  %52 = vst [vmem:[%s101_s1 + $0x10] sm:$0xf] %v43_v13 }

// kernel: encoder_block_forward.2
= control target key start
LH: loop header
LB: loop body
LE: loop exit
PB: predicated region body
PF: predicated region fallthrough
CT: control target
= control target key end

     0   :  { %v526_v1 = vmov 0   ;;  %vm438_vm0 = vcmask 1040384   ;;  %vm440_vm1 = vcmask 1041408   ;;  %vm442_vm2 = vcmask 1042432   ;;  %s736_s1 = inlined_call_operand.vmem [shape: bf16[128,256], index: 1, kind: input, shape index: {}]   ;;  %s737_s0 = inlined_call_operand.vmem [shape: bf16[128,128], index: 0, kind: input, shape index: {}]   ;;  %s738_s2 = inlined_call_operand.vmem [shape: f32[1,8,128], index: 2, kind: output, shape index: {}]  }
   0x1   :  { %v494_v0 = vld [vmem:[%s736_s1 + $0x4] ss:$8 sps:$4 sm:$0xff]   ;;  %204 = vmatprep.mubr.bf16.mxu0 %v526_v1  ;;  %244 = vmatprep.mubr.bf16.mxu1 %v526_v1  ;;  %v496_v2 = vld [vmem:[%s736_s1] ss:$8 sps:$4 sm:$0xff]   ;;  %v497_v3 = vld [vmem:[%s736_s1 + $0x14] ss:$8 sps:$4 sm:$0xff]  }
   0x2   :  { %172 = vmatprep.subr.bf16.mxu0 %v494_v0  ;;  %477 = vmatprep.subr.bf16.mxu1 %v494_v0  ;;  %v499_v4 = vld [vmem:[%s736_s1 + $0x10] ss:$8 sps:$4 sm:$0xff]   ;;  %v500_v5 = vld [vmem:[%s736_s1 + $0x24] ss:$8 sps:$4 sm:$0xff]   ;;  %v502_v6 = vld [vmem:[%s736_s1 + $0x20] ss:$8 sps:$4 sm:$0xff]  }
   0x3   :  { %173 = vmatpush1.bf16.msra.mxu0 %v496_v2  ;;  %485 = vmatpush1.bf16.msra.mxu1 %v496_v2  ;;  %v503_v7 = vld [vmem:[%s736_s1 + $0x34] ss:$8 sps:$4 sm:$0xff]   ;;  %v505_v8 = vld [vmem:[%s736_s1 + $0x30] ss:$8 sps:$4 sm:$0xff]   ;;  %v506_v9 = vld [vmem:[%s736_s1 + $0x44] ss:$8 sps:$4 sm:$0xff]  }
   0x4   :  { %174 = vmatprep.subr.bf16.mxu0 %v497_v3  ;;  %478 = vmatprep.subr.bf16.mxu1 %v497_v3  ;;  %v508_v10 = vld [vmem:[%s736_s1 + $0x40] ss:$8 sps:$4 sm:$0xff]   ;;  %v509_v11 = vld [vmem:[%s736_s1 + $0x54] ss:$8 sps:$4 sm:$0xff]   ;;  %v511_v12 = vld [vmem:[%s736_s1 + $0x50] ss:$8 sps:$4 sm:$0xff]  }
   0x5   :  { %v512_v13 = vld [vmem:[%s736_s1 + $0x64] ss:$8 sps:$4 sm:$0xff]   ;;  %v514_v14 = vld [vmem:[%s736_s1 + $0x60] ss:$8 sps:$4 sm:$0xff]   ;;  %v515_v15 = vld [vmem:[%s736_s1 + $0x74] ss:$8 sps:$4 sm:$0xff]  }
   0x6   :  { %v517_v16 = vld [vmem:[%s736_s1 + $0x70] ss:$8 sps:$4 sm:$0xff]   ;;  %v518_v17 = vld [vmem:[%s737_s0] sm:$0xff]   ;;  %v519_v19 = vld [vmem:[%s737_s0 + $0x8] sm:$0xff]   ;;  %vm444_vm3 = vcmask 1043456   ;;  %vm446_vm4 = vcmask 1044480  }
   0x7   :  { %175 = vmatpush1.bf16.msra.mxu0 %v499_v4  ;;  %486 = vmatpush1.bf16.msra.mxu1 %v499_v4  ;;  %v520_v18 = vld [vmem:[%s737_s0 + $0x20] sm:$0xff]   ;;  %v522_v20 = vld [vmem:[%s737_s0 + $0x28] sm:$0xff]   ;;  %v521_v21 = vld [vmem:[%s737_s0 + $0x10] sm:$0xff]  }
   0x8   :  { %176 = vmatprep.subr.bf16.mxu0 %v500_v5  ;;  %479 = vmatprep.subr.bf16.mxu1 %v500_v5  ;;  %v524_v22 = vld [vmem:[%s737_s0 + $0x30] sm:$0xff]   ;;  %v523_v23 = vld [vmem:[%s737_s0 + $0x18] sm:$0xff]  }
   0x9   :  { %v525_v24 = vld [vmem:[%s737_s0 + $0x38] sm:$0xff]  }
   0xb   :  { %177 = vmatpush1.bf16.msra.mxu0 %v502_v6  ;;  %487 = vmatpush1.bf16.msra.mxu1 %v502_v6 }
   0xc   :  { %178 = vmatprep.subr.bf16.mxu0 %v503_v7  ;;  %480 = vmatprep.subr.bf16.mxu1 %v503_v7 }
   0xf   :  { %179 = vmatpush1.bf16.msra.mxu0 %v505_v8  ;;  %488 = vmatpush1.bf16.msra.mxu1 %v505_v8 }
  0x10   :  { %180 = vmatprep.subr.bf16.mxu0 %v506_v9  ;;  %481 = vmatprep.subr.bf16.mxu1 %v506_v9 }
  0x13   :  { %181 = vmatpush1.bf16.msra.mxu0 %v508_v10  ;;  %489 = vmatpush1.bf16.msra.mxu1 %v508_v10 }
  0x14   :  { %182 = vmatprep.subr.bf16.mxu0 %v509_v11  ;;  %482 = vmatprep.subr.bf16.mxu1 %v509_v11 }
  0x17   :  { %183 = vmatpush1.bf16.msra.mxu0 %v511_v12  ;;  %490 = vmatpush1.bf16.msra.mxu1 %v511_v12 }
  0x18   :  { %184 = vmatprep.subr.bf16.mxu0 %v512_v13  ;;  %483 = vmatprep.subr.bf16.mxu1 %v512_v13 }
  0x1b   :  { %185 = vmatpush1.bf16.msra.mxu0 %v514_v14  ;;  %491 = vmatpush1.bf16.msra.mxu1 %v514_v14 }
  0x1c   :  { %186 = vmatprep.subr.bf16.mxu0 %v515_v15  ;;  %484 = vmatprep.subr.bf16.mxu1 %v515_v15 }
  0x1f   :  { %187 = vmatpush1.bf16.msra.mxu0 %v517_v16  ;;  %492 = vmatpush1.bf16.msra.mxu1 %v517_v16 }
  0x22   :  { %205 = vmatmul.mubr.bf16.vlgmr.msra.gmra.mrb[0].mxu0 %v518_v17  ;;  %245 = vmatmul.mubr.bf16.vlgmr.msra.gmra.mrb[0].mxu1 %v520_v18 }
  0x23   :  { %214 = vmatprep.mubr.bf16.mxu0 %v526_v1  ;;  %254 = vmatprep.mubr.bf16.mxu1 %v526_v1 }
  0x2a   :  { %215 = vmatmul.mubr.bf16.gmra.mrb[4].mxu0 %v519_v19  ;;  %255 = vmatmul.mubr.bf16.gmra.mrb[4].mxu1 %v522_v20 }
  0x2b   :  { %224 = vmatprep.mubr.bf16.mxu0 %v526_v1  ;;  %264 = vmatprep.mubr.bf16.mxu1 %v526_v1 }
  0x32   :  { %225 = vmatmul.mubr.bf16.gmra.mrb[8].mxu0 %v521_v21  ;;  %265 = vmatmul.mubr.bf16.gmra.mrb[8].mxu1 %v524_v22 }
  0x33   :  { %234 = vmatprep.mubr.bf16.mxu0 %v526_v1  ;;  %274 = vmatprep.mubr.bf16.mxu1 %v526_v1 }
  0x3a   :  { %235 = vmatmul.mubr.bf16.gmra.mrb[12].mxu0 %v523_v23  ;;  %275 = vmatmul.mubr.bf16.gmra.mrb[12].mxu1 %v525_v24 }
  0xf5   :  { %v206_v25 = vpop.f32.mrb[0].mxu0  ;;  %v622_v26 = vpop.f32.mrb[0].mxu1 }
  0xf6   :  { %v208_v27 = vpop.f32.mrb[1].mxu0  ;;  %v624_v28 = vpop.f32.mrb[1].mxu1  ;;  %v327_v33 = vmul.f32 %v206_v25, %v206_v25 }
  0xf7   :  { %v401_v29 = vmul.f32 %v208_v27, %v206_v25  ;;  %v210_v30 = vpop.f32.mrb[2].mxu0  ;;  %v628_v31 = vmul.f32 %v624_v28, %v622_v26  ;;  %v630_v32 = vpop.f32.mrb[2].mxu1  ;;  %v364_v38 = vmul.f32 %v208_v27, %v208_v27 }
  0xf8   :  { %v285_v34 = vadd.f32 %v210_v30, %v206_v25  ;;  %v328_v35 = vmul.f32 %v210_v30, %v210_v30  ;;  %v212_v36 = vpop.f32.mrb[3].mxu0  ;;  %v632_v37 = vpop.f32.mrb[3].mxu1 }
  0xf9   :  { %v306_v39 = vadd.f32 %v212_v36, %v208_v27  ;;  %v365_v40 = vmul.f32 %v212_v36, %v212_v36  ;;  %v402_v41 = vmul.f32 %v212_v36, %v210_v30  ;;  %v636_v43 = vmul.f32 %v632_v37, %v630_v32 }
  0xfa   :  { %v343_v42 = vadd.f32 %v328_v35, %v327_v33 }
  0xfb   :  { %v380_v44 = vadd.f32 %v365_v40, %v364_v38  ;;  %v417_v45 = vadd.f32 %v402_v41, %v401_v29 }
  0xfd   :  { %v216_v46 = vpop.f32.mrb[4].mxu0  ;;  %v638_v47 = vpop.f32.mrb[4].mxu1 }
  0xfe   :  { %v286_v48 = vadd.f32 %v285_v34, %v216_v46  ;;  %v329_v49 = vmul.f32 %v216_v46, %v216_v46  ;;  %v218_v50 = vpop.f32.mrb[5].mxu0  ;;  %v640_v51 = vpop.f32.mrb[5].mxu1 }
  0xff   :  { %v307_v52 = vadd.f32 %v306_v39, %v218_v50  ;;  %v366_v53 = vmul.f32 %v218_v50, %v218_v50  ;;  %v403_v54 = vmul.f32 %v218_v50, %v216_v46  ;;  %v220_v55 = vpop.f32.mrb[6].mxu0  ;;  %v642_v56 = vpop.f32.mrb[6].mxu1  ;;  %v646_v61 = vmul.f32 %v640_v51, %v638_v47 }
 0x100   :  { %v344_v57 = vadd.f32 %v343_v42, %v329_v49  ;;  %v287_v58 = vadd.f32 %v286_v48, %v220_v55  ;;  %v330_v59 = vmul.f32 %v220_v55, %v220_v55  ;;  %v222_v60 = vpop.f32.mrb[7].mxu0  ;;  %v648_v62 = vpop.f32.mrb[7].mxu1 }
 0x101   :  { %v381_v63 = vadd.f32 %v380_v44, %v366_v53  ;;  %v418_v0 = vadd.f32 %v417_v45, %v403_v54  ;;  %v308_v1 = vadd.f32 %v307_v52, %v222_v60  ;;  %v367_v2 = vmul.f32 %v222_v60, %v222_v60 }
 0x102   :  { %v345_v3 = vadd.f32 %v344_v57, %v330_v59  ;;  %v404_v4 = vmul.f32 %v222_v60, %v220_v55  ;;  %v652_v6 = vmul.f32 %v648_v62, %v642_v56 }
 0x103   :  { %v382_v5 = vadd.f32 %v381_v63, %v367_v2  ;;  %v335_v2 = vmul.f32 %v622_v26, %v622_v26 }
 0x104   :  { %v419_v7 = vadd.f32 %v418_v0, %v404_v4 }
 0x105   :  { %v226_v8 = vpop.f32.mrb[8].mxu0  ;;  %v654_v9 = vpop.f32.mrb[8].mxu1 }
 0x106   :  { %v288_v10 = vadd.f32 %v287_v58, %v226_v8  ;;  %v331_v11 = vmul.f32 %v226_v8, %v226_v8  ;;  %v228_v12 = vpop.f32.mrb[9].mxu0  ;;  %v656_v13 = vpop.f32.mrb[9].mxu1 }
 0x107   :  { %v309_v14 = vadd.f32 %v308_v1, %v228_v12  ;;  %v368_v15 = vmul.f32 %v228_v12, %v228_v12  ;;  %v405_v16 = vmul.f32 %v228_v12, %v226_v8  ;;  %v230_v17 = vpop.f32.mrb[10].mxu0  ;;  %v658_v18 = vpop.f32.mrb[10].mxu1  ;;  %v662_v23 = vmul.f32 %v656_v13, %v654_v9 }
 0x108   :  { %v346_v19 = vadd.f32 %v345_v3, %v331_v11  ;;  %v289_v20 = vadd.f32 %v288_v10, %v230_v17  ;;  %v332_v21 = vmul.f32 %v230_v17, %v230_v17  ;;  %v232_v22 = vpop.f32.mrb[11].mxu0  ;;  %v664_v24 = vpop.f32.mrb[11].mxu1  ;;  %v336_v12 = vmul.f32 %v630_v32, %v630_v32 }
 0x109   :  { %v383_v25 = vadd.f32 %v382_v5, %v368_v15  ;;  %v420_v27 = vadd.f32 %v419_v7, %v405_v16  ;;  %v310_v29 = vadd.f32 %v309_v14, %v232_v22  ;;  %v369_v30 = vmul.f32 %v232_v22, %v232_v22 }
 0x10a   :  { %v347_v33 = vadd.f32 %v346_v19, %v332_v21  ;;  %v406_v34 = vmul.f32 %v232_v22, %v230_v17  ;;  %v668_v36 = vmul.f32 %v664_v24, %v658_v18  ;;  %v372_v7 = vmul.f32 %v624_v28, %v624_v28 }
 0x10b   :  { %v384_v35 = vadd.f32 %v383_v25, %v369_v30  ;;  %v374_v25 = vmul.f32 %v640_v51, %v640_v51 }
 0x10c   :  { %v421_v38 = vadd.f32 %v420_v27, %v406_v34  ;;  %v375_v34 = vmul.f32 %v648_v62, %v648_v62 }
 0x10d   :  { %v236_v39 = vpop.f32.mrb[12].mxu0  ;;  %v670_v40 = vpop.f32.mrb[12].mxu1 }
 0x10e   :  { %v290_v41 = vadd.f32 %v289_v20, %v236_v39  ;;  %v333_v42 = vmul.f32 %v236_v39, %v236_v39  ;;  %v238_v44 = vpop.f32.mrb[13].mxu0  ;;  %v672_v45 = vpop.f32.mrb[13].mxu1  ;;  %v337_v20 = vmul.f32 %v638_v47, %v638_v47 }
 0x10f   :  { %v311_v46 = vadd.f32 %v310_v29, %v238_v44  ;;  %v370_v48 = vmul.f32 %v238_v44, %v238_v44  ;;  %v407_v49 = vmul.f32 %v238_v44, %v236_v39  ;;  %v240_v50 = vpop.f32.mrb[14].mxu0  ;;  %v674_v52 = vpop.f32.mrb[14].mxu1  ;;  %v678_v58 = vmul.f32 %v672_v45, %v670_v40 }
 0x110   :  { %v348_v53 = vadd.f32 %v347_v33, %v333_v42  ;;  %v291_v54 = vadd.f32 %v290_v41, %v240_v50  ;;  %v334_v55 = vmul.f32 %v240_v50, %v240_v50  ;;  %v242_v57 = vpop.f32.mrb[15].mxu0  ;;  %v282_v59 = vpop.f32.mrb[15].mxu1  ;;  %v338_v29 = vmul.f32 %v642_v56, %v642_v56 }
 0x111   :  { %v385_v60 = vadd.f32 %v384_v35, %v370_v48  ;;  %v422_v63 = vadd.f32 %v421_v38, %v407_v49  ;;  %v312_v0 = vadd.f32 %v311_v46, %v242_v57  ;;  %v371_v1 = vmul.f32 %v242_v57, %v242_v57 }
 0x112   :  { %v292_v3 = vadd.f32 %v291_v54, %v622_v26  ;;  %v349_v4 = vadd.f32 %v348_v53, %v334_v55  ;;  %v408_v5 = vmul.f32 %v242_v57, %v240_v50  ;;  %v416_v11 = vmul.f32 %v282_v59, %v674_v52 }
 0x113   :  { %v313_v8 = vadd.f32 %v312_v0, %v624_v28  ;;  %v386_v10 = vadd.f32 %v385_v60, %v371_v1  ;;  %v373_v26 = vmul.f32 %v632_v37, %v632_v37  ;;  %v339_v38 = vmul.f32 %v654_v9, %v654_v9 }
 0x114   :  { %v293_v14 = vadd.f32 %v292_v3, %v630_v32  ;;  %v350_v15 = vadd.f32 %v349_v4, %v335_v2  ;;  %v423_v16 = vadd.f32 %v422_v63, %v408_v5  ;;  %v340_v42 = vmul.f32 %v658_v18, %v658_v18 }
 0x115   :  { %v314_v17 = vadd.f32 %v313_v8, %v632_v37  ;;  %v387_v19 = vadd.f32 %v386_v10, %v372_v7  ;;  %v377_v49 = vmul.f32 %v664_v24, %v664_v24  ;;  %v342_v63 = vmul.f32 %v674_v52, %v674_v52 }
 0x116   :  { %v351_v28 = vadd.f32 %v350_v15, %v336_v12  ;;  %v424_v21 = vadd.f32 %v423_v16, %v628_v31  ;;  %v294_v22 = vadd.f32 %v293_v14, %v638_v47  ;;  %v379_v1 = vmul.f32 %v282_v59, %v282_v59 }
 0x117   :  { %v388_v32 = vadd.f32 %v387_v19, %v373_v26  ;;  %v315_v27 = vadd.f32 %v314_v17, %v640_v51 }
 0x118   :  { %v425_v37 = vadd.f32 %v424_v21, %v636_v43  ;;  %v295_v30 = vadd.f32 %v294_v22, %v642_v56  ;;  %v352_v33 = vadd.f32 %v351_v28, %v337_v20  ;;  %v376_v43 = vmul.f32 %v656_v13, %v656_v13 }
 0x119   :  { %v316_v31 = vadd.f32 %v315_v27, %v648_v62  ;;  %v389_v47 = vadd.f32 %v388_v32, %v374_v25 }
 0x11a   :  { %v296_v35 = vadd.f32 %v295_v30, %v654_v9  ;;  %v353_v51 = vadd.f32 %v352_v33, %v338_v29  ;;  %v426_v39 = vadd.f32 %v425_v37, %v646_v61  ;;  %v341_v9 = vmul.f32 %v670_v40, %v670_v40 }
 0x11b   :  { %v317_v41 = vadd.f32 %v316_v31, %v656_v13  ;;  %v390_v56 = vadd.f32 %v389_v47, %v375_v34  ;;  %v378_v13 = vmul.f32 %v672_v45, %v672_v45 }
 0x11c   :  { %v354_v44 = vadd.f32 %v353_v51, %v339_v38  ;;  %v427_v62 = vadd.f32 %v426_v39, %v652_v6  ;;  %v297_v46 = vadd.f32 %v296_v35, %v658_v18 }
 0x11d   :  { %v391_v48 = vadd.f32 %v390_v56, %v376_v43  ;;  %v318_v61 = vadd.f32 %v317_v41, %v664_v24 }
 0x11e   :  { %v428_v50 = vadd.f32 %v427_v62, %v662_v23  ;;  %v355_v53 = vadd.f32 %v354_v44, %v340_v42  ;;  %v298_v54 = vadd.f32 %v297_v46, %v670_v40 }
 0x11f   :  { %v392_v6 = vadd.f32 %v391_v48, %v377_v49  ;;  %v319_v18 = vadd.f32 %v318_v61, %v672_v45 }
 0x120   :  { %v429_v55 = vadd.f32 %v428_v50, %v668_v36  ;;  %v356_v57 = vadd.f32 %v355_v53, %v341_v9  ;;  %v299_v60 = vadd.f32 %v298_v54, %v674_v52 }
 0x121   :  { %v393_v24 = vadd.f32 %v392_v6, %v378_v13  ;;  %v320_v0 = vadd.f32 %v319_v18, %v282_v59 }
 0x122   :  { %v430_v2 = vadd.f32 %v429_v55, %v678_v58  ;;  %v300_v23 = vrot.slane %v299_v60, 4  ;;  %v357_v3 = vadd.f32 %v356_v57, %v342_v63 }
 0x123   :  { %v321_v4 = vrot.slane %v320_v0, 4  ;;  %v394_v40 = vadd.f32 %v393_v24, %v379_v1 }
 0x124   :  { %v301_v5 = vadd.f32 %v300_v23, %v299_v60  ;;  %v358_v7 = vrot.slane %v357_v3, 4  ;;  %v431_v45 = vadd.f32 %v430_v2, %v416_v11 }
 0x125   :  { %v322_v8 = vadd.f32 %v321_v4, %v320_v0  ;;  %v395_v36 = vrot.slane %v394_v40, 4 }
 0x126   :  { %v302_v10 = vrot.slane %v301_v5, 2  ;;  %v359_v12 = vadd.f32 %v358_v7, %v357_v3  ;;  %v432_v14 = vrot.slane %v431_v45, 4 }
 0x127   :  { %v323_v15 = vrot.slane %v322_v8, 2  ;;  %v396_v16 = vadd.f32 %v395_v36, %v394_v40 }
 0x128   :  { %v303_v52 = vadd.f32 %v302_v10, %v301_v5  ;;  %v360_v26 = vrot.slane %v359_v12, 2  ;;  %v433_v17 = vadd.f32 %v432_v14, %v431_v45 }
 0x129   :  { %v324_v59 = vadd.f32 %v323_v15, %v322_v8  ;;  %v397_v19 = vrot.slane %v396_v16, 2 }
 0x12a   :  { %v304_v58 = vrot.slane %v303_v52, 1  ;;  %v361_v20 = vadd.f32 %v360_v26, %v359_v12  ;;  %v434_v28 = vrot.slane %v433_v17, 2 }
 0x12b   :  { %v325_v21 = vrot.slane %v324_v59, 1  ;;  %v398_v22 = vadd.f32 %v397_v19, %v396_v16 }
 0x12c   :  { %v305_v25 = vadd.f32 %v304_v58, %v303_v52  ;;  %v362_v32 = vrot.slane %v361_v20, 1  ;;  %v435_v11 = vadd.f32 %v434_v28, %v433_v17 }
 0x12d   :  { %v326_v27 = vadd.f32 %v325_v21, %v324_v59  ;;  %v399_v29 = vrot.slane %v398_v22, 1 }
 0x12e   :  { %v363_v37 = vadd.f32 %v362_v32, %v361_v20  ;;  %v436_v30 = vrot.slane %v435_v11, 1 }
 0x12f   :  { %v400_v33 = vadd.f32 %v399_v29, %v398_v22  ;;  %v439_v34 = vsel %vm438_vm0, %v305_v25, %v326_v27 }
 0x130   :  { %v437_v31 = vadd.f32 %v436_v30, %v435_v11  ;;  %v441_v47 = vsel %vm440_vm1, %v439_v34, %v363_v37 }
 0x131   :  { %v443_v35 = vsel %vm442_vm2, %v441_v47, %v400_v33 }
 0x132   :  { %v445_v38 = vsel %vm444_vm3, %v443_v35, %v437_v31 }
 0x133   :  { %v447_v51 = vsel %vm446_vm4, %v445_v38, 0.0 }
 0x134   :  { %448 = vst [vmem:[%s738_s2] sm:$0xff] %v447_v51 }

// kernel: custom-call
= control target key start
LH: loop header
LB: loop body
LE: loop exit
PB: predicated region body
PF: predicated region fallthrough
CT: control target
= control target key end

     0   :  { %s126_s0 = inlined_call_operand.vmem [shape: f32[2,8,8,8], index: 0, kind: input, shape index: {}]   ;;  %s127_s1 = inlined_call_operand.vmem [shape: f32[2,8,8,8], index: 1, kind: input, shape index: {}]   ;;  %s128_s2 = inlined_call_operand.hbm [shape: c64[2,8,8,8], index: 2, kind: output, shape index: {}]  }
   0x1   :  { %s87_s11 = scalar_lea.hbm %s128_s2, 2048 }
   0x2   :  { %4 = vsyncpa [#allocation0], 0  ;;  %s5_s14 = sshll.u32 %s126_s0, 4  ;;  %s6_s14 = int_to_ptr.vmem [resolvable:$true] %s5_s14 }
   0x3   :  { %s18_s15 = scalar_lea.vmem %s6_s14, 2048  ;;  %p23_p1 = scmp.lt.s32.totalorder %s6_s14, %s6_s14 }
   0x4   :  { %p19_p0 = scmp.ne.s32.totalorder %s6_s14, %s18_s15  ;;  %p24_p2 = scmp.lt.s32.totalorder %s18_s15, %s18_s15 }
   0x6   :  { %p25_p3 = por %p24_p2, %p23_p1 }
   0x8   :  { %p26_p4 = pnand %p25_p3, %p19_p0 }
   0xa   :  { %29 = shalt.err (!%p26_p4)  }
   0xb   :  { %p31_p5 = scmp.ne.s32.totalorder %s128_s2, %s87_s11  ;;  %s32_s0 = scalar_lea.hbm %s128_s2, 4096 }
   0xc   :  { %p33_p6 = scmp.lt.u32.totalorder %s32_s0, %s87_s11  ;;  %p34_p7 = scmp.lt.u32.totalorder %s87_s11, %s128_s2 }
   0xe   :  { %p35_p8 = por %p34_p7, %p33_p6 }
  0x10   :  { %p36_p9 = pnand %p35_p8, %p31_p5 }
  0x12   :  { %39 = shalt.err (!%p36_p9)  }
  0x13   :  { %8 = dma.vmem_to_hbm [thread:$0]  %s6_s14, 2048, %s128_s2, [#allocation0] }
  0x14   :  { %65 = dma.done.wait [#allocation0], 2048  }
  0x15   :  { %66 = vsyncadd [#allocation0], 4294965248 }
  0x16   :  { %10 = vsyncpa [#allocation0], 1 }
  0x17   :  { %11 = vsyncpa [#allocation1], 0  ;;  %s12_s28 = sshll.u32 %s127_s1, 4  ;;  %s13_s28 = int_to_ptr.vmem [resolvable:$true] %s12_s28 }
  0x18   :  { %s40_s29 = scalar_lea.vmem %s13_s28, 2048  ;;  %p45_p11 = scmp.lt.s32.totalorder %s13_s28, %s13_s28 }
  0x19   :  { %p41_p10 = scmp.ne.s32.totalorder %s13_s28, %s40_s29  ;;  %p46_p12 = scmp.lt.s32.totalorder %s40_s29, %s40_s29 }
  0x1b   :  { %p47_p13 = por %p46_p12, %p45_p11 }
  0x1d   :  { %p48_p0 = pnand %p47_p13, %p41_p10 }
  0x1f   :  { %51 = shalt.err (!%p48_p0)  }
  0x20   :  { %p53_p1 = scmp.ne.s32.totalorder %s87_s11, %s32_s0  ;;  %p56_p2 = scmp.lt.u32.totalorder %s32_s0, %s32_s0 }
  0x22   :  { %p57_p3 = por %p56_p2, %p34_p7 }
  0x24   :  { %p59_p4 = por %p57_p3, %p33_p6 }
  0x26   :  { %p60_p5 = pnand %p59_p4, %p53_p1 }
  0x28   :  { %63 = shalt.err (!%p60_p5)  }
  0x29   :  { %15 = dma.vmem_to_hbm [thread:$0]  %s13_s28, 2048, %s87_s11, [#allocation1] }
  0x2a   :  { %67 = dma.done.wait [#allocation1], 2048  }
  0x2b   :  { %68 = vsyncadd [#allocation1], 4294965248 }
  0x2c   :  { %17 = vsyncpa [#allocation1], 1 }

// kernel: encoder_block_forward.3
= control target key start
LH: loop header
LB: loop body
LE: loop exit
PB: predicated region body
PF: predicated region fallthrough
CT: control target
= control target key end

     0   :  { %v647_v1 = vmov 0   ;;  %v290_v25 = vlaneseq  ;;  %s1022_s1 = inlined_call_operand.vmem [shape: bf16[128,256], index: 1, kind: input, shape index: {}]   ;;  %s1023_s0 = inlined_call_operand.vmem [shape: bf16[128,128], index: 0, kind: input, shape index: {}]   ;;  %s1024_s2 = inlined_call_operand.vmem [shape: f32[8,256], index: 2, kind: input, shape index: {}]   ;;  %s1025_s3 = inlined_call_operand.vmem [shape: f32[128,256], index: 3, kind: output, shape index: {}]  }
   0x1   :  { %v615_v0 = vld [vmem:[%s1022_s1 + $0x4] ss:$8 sps:$4 sm:$0xff]   ;;  %207 = vmatprep.mubr.bf16.mxu0 %v647_v1  ;;  %247 = vmatprep.mubr.bf16.mxu1 %v647_v1  ;;  %v617_v2 = vld [vmem:[%s1022_s1] ss:$8 sps:$4 sm:$0xff]   ;;  %v618_v3 = vld [vmem:[%s1022_s1 + $0x14] ss:$8 sps:$4 sm:$0xff]  }
   0x2   :  { %175 = vmatprep.subr.bf16.mxu0 %v615_v0  ;;  %598 = vmatprep.subr.bf16.mxu1 %v615_v0  ;;  %v620_v4 = vld [vmem:[%s1022_s1 + $0x10] ss:$8 sps:$4 sm:$0xff]   ;;  %v621_v5 = vld [vmem:[%s1022_s1 + $0x24] ss:$8 sps:$4 sm:$0xff]   ;;  %v623_v6 = vld [vmem:[%s1022_s1 + $0x20] ss:$8 sps:$4 sm:$0xff]  }
   0x3   :  { %176 = vmatpush1.bf16.msra.mxu0 %v617_v2  ;;  %606 = vmatpush1.bf16.msra.mxu1 %v617_v2  ;;  %v624_v7 = vld [vmem:[%s1022_s1 + $0x34] ss:$8 sps:$4 sm:$0xff]   ;;  %v626_v8 = vld [vmem:[%s1022_s1 + $0x30] ss:$8 sps:$4 sm:$0xff]   ;;  %v627_v9 = vld [vmem:[%s1022_s1 + $0x44] ss:$8 sps:$4 sm:$0xff]  }
   0x4   :  { %177 = vmatprep.subr.bf16.mxu0 %v618_v3  ;;  %599 = vmatprep.subr.bf16.mxu1 %v618_v3  ;;  %v629_v10 = vld [vmem:[%s1022_s1 + $0x40] ss:$8 sps:$4 sm:$0xff]   ;;  %v630_v11 = vld [vmem:[%s1022_s1 + $0x54] ss:$8 sps:$4 sm:$0xff]   ;;  %v632_v12 = vld [vmem:[%s1022_s1 + $0x50] ss:$8 sps:$4 sm:$0xff]  }
   0x5   :  { %v633_v13 = vld [vmem:[%s1022_s1 + $0x64] ss:$8 sps:$4 sm:$0xff]   ;;  %v635_v14 = vld [vmem:[%s1022_s1 + $0x60] ss:$8 sps:$4 sm:$0xff]   ;;  %v636_v15 = vld [vmem:[%s1022_s1 + $0x74] ss:$8 sps:$4 sm:$0xff]  }
   0x6   :  { %v638_v16 = vld [vmem:[%s1022_s1 + $0x70] ss:$8 sps:$4 sm:$0xff]   ;;  %v639_v17 = vld [vmem:[%s1023_s0] sm:$0xff]   ;;  %v641_v19 = vld [vmem:[%s1023_s0 + $0x8] sm:$0xff]   ;;  %v291_v26 = vshrl.u32 %v290_v25, 7 }
   0x7   :  { %178 = vmatpush1.bf16.msra.mxu0 %v620_v4  ;;  %607 = vmatpush1.bf16.msra.mxu1 %v620_v4  ;;  %v640_v18 = vld [vmem:[%s1023_s0 + $0x20] sm:$0xff]   ;;  %v642_v20 = vld [vmem:[%s1023_s0 + $0x28] sm:$0xff]   ;;  %v643_v21 = vld [vmem:[%s1023_s0 + $0x10] sm:$0xff]  }
   0x8   :  { %179 = vmatprep.subr.bf16.mxu0 %v621_v5  ;;  %600 = vmatprep.subr.bf16.mxu1 %v621_v5  ;;  %v644_v22 = vld [vmem:[%s1023_s0 + $0x30] sm:$0xff]   ;;  %v645_v23 = vld [vmem:[%s1023_s0 + $0x18] sm:$0xff]   ;;  %v292_v27 = vsub.s32 0, %v291_v26  ;;  %v288_v28 = vld [vmem:[%s1024_s2] sm:$0xff]  ;;  %v312_v30 = vsub.s32 1, %v291_v26  ;;  %v348_v31 = vsub.s32 2, %v291_v26 }
   0x9   :  { %v646_v24 = vld [vmem:[%s1023_s0 + $0x38] sm:$0xff]   ;;  %v289_v29 = vld [vmem:[%s1024_s2 + $0x8] sm:$0xff] }
   0xa   :  { %v754_v32 = vrot.slane %v288_v28, %v292_v27  ;;  %v756_v33 = vrot.slane %v289_v29, %v292_v27  ;;  %v758_v34 = vrot.slane %v288_v28, %v312_v30  ;;  %v760_v35 = vrot.slane %v289_v29, %v312_v30 }
   0xb   :  { %180 = vmatpush1.bf16.msra.mxu0 %v623_v6  ;;  %608 = vmatpush1.bf16.msra.mxu1 %v623_v6  ;;  %v762_v38 = vrot.slane %v288_v28, %v348_v31  ;;  %v764_v39 = vrot.slane %v289_v29, %v348_v31 }
   0xc   :  { %181 = vmatprep.subr.bf16.mxu0 %v624_v7  ;;  %601 = vmatprep.subr.bf16.mxu1 %v624_v7 }
   0xf   :  { %182 = vmatpush1.bf16.msra.mxu0 %v626_v8  ;;  %609 = vmatpush1.bf16.msra.mxu1 %v626_v8 }
  0x10   :  { %183 = vmatprep.subr.bf16.mxu0 %v627_v9  ;;  %602 = vmatprep.subr.bf16.mxu1 %v627_v9 }
  0x13   :  { %184 = vmatpush1.bf16.msra.mxu0 %v629_v10  ;;  %610 = vmatpush1.bf16.msra.mxu1 %v629_v10 }
  0x14   :  { %185 = vmatprep.subr.bf16.mxu0 %v630_v11  ;;  %603 = vmatprep.subr.bf16.mxu1 %v630_v11 }
  0x17   :  { %186 = vmatpush1.bf16.msra.mxu0 %v632_v12  ;;  %611 = vmatpush1.bf16.msra.mxu1 %v632_v12 }
  0x18   :  { %187 = vmatprep.subr.bf16.mxu0 %v633_v13  ;;  %604 = vmatprep.subr.bf16.mxu1 %v633_v13 }
  0x1b   :  { %188 = vmatpush1.bf16.msra.mxu0 %v635_v14  ;;  %612 = vmatpush1.bf16.msra.mxu1 %v635_v14 }
  0x1c   :  { %189 = vmatprep.subr.bf16.mxu0 %v636_v15  ;;  %605 = vmatprep.subr.bf16.mxu1 %v636_v15 }
  0x1f   :  { %190 = vmatpush1.bf16.msra.mxu0 %v638_v16  ;;  %613 = vmatpush1.bf16.msra.mxu1 %v638_v16 }
  0x22   :  { %208 = vmatmul.mubr.bf16.vlgmr.msra.gmra.mrb[0].mxu0 %v639_v17  ;;  %248 = vmatmul.mubr.bf16.vlgmr.msra.gmra.mrb[0].mxu1 %v640_v18 }
  0x23   :  { %217 = vmatprep.mubr.bf16.mxu0 %v647_v1  ;;  %257 = vmatprep.mubr.bf16.mxu1 %v647_v1 }
  0x2a   :  { %218 = vmatmul.mubr.bf16.gmra.mrb[4].mxu0 %v641_v19  ;;  %258 = vmatmul.mubr.bf16.gmra.mrb[4].mxu1 %v642_v20 }
  0x2b   :  { %227 = vmatprep.mubr.bf16.mxu0 %v647_v1  ;;  %267 = vmatprep.mubr.bf16.mxu1 %v647_v1 }
  0x32   :  { %228 = vmatmul.mubr.bf16.gmra.mrb[8].mxu0 %v643_v21  ;;  %268 = vmatmul.mubr.bf16.gmra.mrb[8].mxu1 %v644_v22 }
  0x33   :  { %237 = vmatprep.mubr.bf16.mxu0 %v647_v1  ;;  %277 = vmatprep.mubr.bf16.mxu1 %v647_v1 }
  0x3a   :  { %238 = vmatmul.mubr.bf16.gmra.mrb[12].mxu0 %v645_v23  ;;  %278 = vmatmul.mubr.bf16.gmra.mrb[12].mxu1 %v646_v24 }
  0xf5   :  { %v209_v36 = vpop.f32.mrb[0].mxu0  ;;  %v249_v37 = vpop.f32.mrb[0].mxu1 }
  0xf6   :  { %v294_v40 = vmul.f32 %v754_v32, %v209_v36  ;;  %v370_v41 = vmul.f32 %v756_v33, %v209_v36  ;;  %v302_v42 = vmul.f32 %v754_v32, %v249_v37  ;;  %v378_v43 = vmul.f32 %v756_v33, %v249_v37  ;;  %v211_v44 = vpop.f32.mrb[1].mxu0  ;;  %v251_v45 = vpop.f32.mrb[1].mxu1 }
  0xf7   :  { %v314_v46 = vmul.f32 %v758_v34, %v211_v44  ;;  %v390_v47 = vmul.f32 %v760_v35, %v211_v44  ;;  %v322_v48 = vmul.f32 %v758_v34, %v251_v45  ;;  %v398_v49 = vmul.f32 %v760_v35, %v251_v45  ;;  %v213_v50 = vpop.f32.mrb[2].mxu0  ;;  %v253_v51 = vpop.f32.mrb[2].mxu1 }
  0xf8   :  { %v295_v52 = vmul.f32 %v754_v32, %v213_v50  ;;  %v371_v53 = vmul.f32 %v756_v33, %v213_v50  ;;  %v303_v54 = vmul.f32 %v754_v32, %v253_v51  ;;  %v379_v55 = vmul.f32 %v756_v33, %v253_v51  ;;  %v215_v56 = vpop.f32.mrb[3].mxu0  ;;  %v255_v57 = vpop.f32.mrb[3].mxu1 }
  0xf9   :  { %v330_v58 = vadd.f32 %v314_v46, %v294_v40  ;;  %v406_v59 = vadd.f32 %v390_v47, %v370_v41  ;;  %v338_v60 = vadd.f32 %v322_v48, %v302_v42  ;;  %v414_v61 = vadd.f32 %v398_v49, %v378_v43 }
  0xfa   :  { %v315_v62 = vmul.f32 %v758_v34, %v215_v56  ;;  %v391_v63 = vmul.f32 %v760_v35, %v215_v56  ;;  %v323_v0 = vmul.f32 %v758_v34, %v255_v57  ;;  %v399_v1 = vmul.f32 %v760_v35, %v255_v57 }
  0xfb   :  { %v350_v2 = vadd.f32 %v762_v38, %v330_v58  ;;  %v426_v3 = vadd.f32 %v764_v39, %v406_v59  ;;  %v358_v4 = vadd.f32 %v762_v38, %v338_v60  ;;  %v434_v5 = vadd.f32 %v764_v39, %v414_v61 }
  0xfc   :  { %v331_v6 = vadd.f32 %v315_v62, %v295_v52  ;;  %v407_v7 = vadd.f32 %v391_v63, %v371_v53  ;;  %v339_v8 = vadd.f32 %v323_v0, %v303_v54  ;;  %v415_v9 = vadd.f32 %v399_v1, %v379_v55 }
  0xfd   :  { %vm442_vm0 = vcmp.ge.f32.partialorder %v350_v2, 0.0  ;;  %vm443_vm1 = vcmp.ge.f32.partialorder %v426_v3, 0.0  ;;  %v474_v10 = vmul.f32 0.2, %v350_v2  ;;  %v475_v11 = vmul.f32 0.2, %v426_v3 }
  0xfe   :  { %vm458_vm2 = vcmp.ge.f32.partialorder %v358_v4, 0.0  ;;  %vm459_vm3 = vcmp.ge.f32.partialorder %v434_v5, 0.0  ;;  %v490_v12 = vmul.f32 0.2, %v358_v4  ;;  %v491_v13 = vmul.f32 0.2, %v434_v5 }
  0xff   :  { %v506_v14 = vsel %vm442_vm0, %v350_v2, %v474_v10  ;;  %v507_v15 = vsel %vm443_vm1, %v426_v3, %v475_v11  ;;  %v351_v16 = vadd.f32 %v762_v38, %v331_v6  ;;  %v427_v17 = vadd.f32 %v764_v39, %v407_v7  ;;  %v219_v18 = vpop.f32.mrb[4].mxu0  ;;  %v259_v19 = vpop.f32.mrb[4].mxu1 }
 0x100   :  { %538 = vst [vmem:[%s1025_s3] sm:$0xff] %v506_v14  ;;  %539 = vst [vmem:[%s1025_s3 + $0x8] sm:$0xff] %v507_v15  ;;  %v522_v20 = vsel %vm458_vm2, %v358_v4, %v490_v12  ;;  %v523_v21 = vsel %vm459_vm3, %v434_v5, %v491_v13  ;;  %v359_v22 = vadd.f32 %v762_v38, %v339_v8  ;;  %v221_v24 = vpop.f32.mrb[5].mxu0  ;;  %v261_v25 = vpop.f32.mrb[5].mxu1 }
 0x101   :  { %v435_v23 = vadd.f32 %v764_v39, %v415_v9  ;;  %554 = vst [vmem:[%s1025_s3 + $0x80] sm:$0xff] %v522_v20  ;;  %555 = vst [vmem:[%s1025_s3 + $0x88] sm:$0xff] %v523_v21  ;;  %vm444_vm4 = vcmp.ge.f32.partialorder %v351_v16, 0.0  ;;  %vm445_vm5 = vcmp.ge.f32.partialorder %v427_v17, 0.0  ;;  %v476_v26 = vmul.f32 0.2, %v351_v16 }
 0x102   :  { %v477_v27 = vmul.f32 0.2, %v427_v17  ;;  %vm460_vm6 = vcmp.ge.f32.partialorder %v359_v22, 0.0  ;;  %v492_v28 = vmul.f32 0.2, %v359_v22  ;;  %v296_v36 = vmul.f32 %v754_v32, %v219_v18  ;;  %v223_v40 = vpop.f32.mrb[6].mxu0 }
 0x103   :  { %vm461_vm7 = vcmp.ge.f32.partialorder %v435_v23, 0.0  ;;  %v493_v29 = vmul.f32 0.2, %v435_v23  ;;  %v508_v30 = vsel %vm444_vm4, %v351_v16, %v476_v26  ;;  %v372_v37 = vmul.f32 %v756_v33, %v219_v18  ;;  %v263_v41 = vpop.f32.mrb[6].mxu1  ;;  %v225_v46 = vpop.f32.mrb[7].mxu0 }
 0x104   :  { %v509_v31 = vsel %vm445_vm5, %v427_v17, %v477_v27  ;;  %540 = vst [vmem:[%s1025_s3 + $0x10] sm:$0xff] %v508_v30  ;;  %v524_v42 = vsel %vm460_vm6, %v359_v22, %v492_v28  ;;  %v304_v44 = vmul.f32 %v754_v32, %v259_v19  ;;  %v380_v45 = vmul.f32 %v756_v33, %v259_v19  ;;  %v265_v47 = vpop.f32.mrb[7].mxu1 }
 0x105   :  { %541 = vst [vmem:[%s1025_s3 + $0x18] sm:$0xff] %v509_v31  ;;  %v525_v43 = vsel %vm461_vm7, %v435_v23, %v493_v29  ;;  %556 = vst [vmem:[%s1025_s3 + $0x90] sm:$0xff] %v524_v42  ;;  %v316_v48 = vmul.f32 %v758_v34, %v221_v24  ;;  %v392_v49 = vmul.f32 %v760_v35, %v221_v24  ;;  %v822_v52 = vpop.f32.mrb[8].mxu0  ;;  %v824_v53 = vpop.f32.mrb[8].mxu1 }
 0x106   :  { %557 = vst [vmem:[%s1025_s3 + $0x98] sm:$0xff] %v525_v43  ;;  %v324_v50 = vmul.f32 %v758_v34, %v261_v25  ;;  %v400_v51 = vmul.f32 %v760_v35, %v261_v25  ;;  %v297_v54 = vmul.f32 %v754_v32, %v223_v40  ;;  %v373_v55 = vmul.f32 %v756_v33, %v223_v40  ;;  %v830_v58 = vpop.f32.mrb[9].mxu0  ;;  %v832_v59 = vpop.f32.mrb[9].mxu1 }
 0x107   :  { %v305_v56 = vmul.f32 %v754_v32, %v263_v41  ;;  %v381_v57 = vmul.f32 %v756_v33, %v263_v41  ;;  %v332_v60 = vadd.f32 %v316_v48, %v296_v36  ;;  %v408_v61 = vadd.f32 %v392_v49, %v372_v37  ;;  %v834_v0 = vpop.f32.mrb[10].mxu0  ;;  %v836_v1 = vpop.f32.mrb[10].mxu1 }
 0x108   :  { %v340_v62 = vadd.f32 %v324_v50, %v304_v44  ;;  %v416_v63 = vadd.f32 %v400_v51, %v380_v45  ;;  %v317_v2 = vmul.f32 %v758_v34, %v225_v46  ;;  %v393_v3 = vmul.f32 %v760_v35, %v225_v46  ;;  %v842_v6 = vpop.f32.mrb[11].mxu0  ;;  %v844_v7 = vpop.f32.mrb[11].mxu1 }
 0x109   :  { %v325_v4 = vmul.f32 %v758_v34, %v265_v47  ;;  %v401_v5 = vmul.f32 %v760_v35, %v265_v47  ;;  %v352_v8 = vadd.f32 %v762_v38, %v332_v60  ;;  %v428_v9 = vadd.f32 %v764_v39, %v408_v61 }
 0x10a   :  { %v360_v10 = vadd.f32 %v762_v38, %v340_v62  ;;  %v436_v11 = vadd.f32 %v764_v39, %v416_v63  ;;  %v333_v12 = vadd.f32 %v317_v2, %v297_v54  ;;  %v409_v13 = vadd.f32 %v393_v3, %v373_v55 }
 0x10b   :  { %v341_v14 = vadd.f32 %v325_v4, %v305_v56  ;;  %v417_v15 = vadd.f32 %v401_v5, %v381_v57  ;;  %vm446_vm8 = vcmp.ge.f32.partialorder %v352_v8, 0.0  ;;  %vm447_vm9 = vcmp.ge.f32.partialorder %v428_v9, 0.0 }
 0x10c   :  { %v478_v16 = vmul.f32 0.2, %v352_v8  ;;  %v479_v17 = vmul.f32 0.2, %v428_v9  ;;  %vm462_vm10 = vcmp.ge.f32.partialorder %v360_v10, 0.0  ;;  %vm463_vm11 = vcmp.ge.f32.partialorder %v436_v11, 0.0 }
 0x10d   :  { %v494_v18 = vmul.f32 0.2, %v360_v10  ;;  %v495_v19 = vmul.f32 0.2, %v436_v11  ;;  %v353_v22 = vadd.f32 %v762_v38, %v333_v12  ;;  %v429_v23 = vadd.f32 %v764_v39, %v409_v13  ;;  %v852_v24 = vpop.f32.mrb[12].mxu0  ;;  %v854_v25 = vpop.f32.mrb[12].mxu1 }
 0x10e   :  { %v510_v20 = vsel %vm446_vm8, %v352_v8, %v478_v16  ;;  %v511_v21 = vsel %vm447_vm9, %v428_v9, %v479_v17  ;;  %v361_v28 = vadd.f32 %v762_v38, %v341_v14  ;;  %v437_v29 = vadd.f32 %v764_v39, %v417_v15  ;;  %v864_v30 = vpop.f32.mrb[13].mxu0  ;;  %v866_v31 = vpop.f32.mrb[13].mxu1 }
 0x10f   :  { %542 = vst [vmem:[%s1025_s3 + $0x20] sm:$0xff] %v510_v20  ;;  %543 = vst [vmem:[%s1025_s3 + $0x28] sm:$0xff] %v511_v21  ;;  %v526_v26 = vsel %vm462_vm10, %v360_v10, %v494_v18  ;;  %v527_v27 = vsel %vm463_vm11, %v436_v11, %v495_v19  ;;  %vm448_vm12 = vcmp.ge.f32.partialorder %v353_v22, 0.0  ;;  %vm449_vm13 = vcmp.ge.f32.partialorder %v429_v23, 0.0  ;;  %v878_v46 = vpop.f32.mrb[14].mxu0  ;;  %v880_v47 = vpop.f32.mrb[14].mxu1 }
 0x110   :  { %558 = vst [vmem:[%s1025_s3 + $0xa0] sm:$0xff] %v526_v26  ;;  %559 = vst [vmem:[%s1025_s3 + $0xa8] sm:$0xff] %v527_v27  ;;  %v480_v36 = vmul.f32 0.2, %v353_v22  ;;  %v481_v37 = vmul.f32 0.2, %v429_v23  ;;  %v298_v44 = vmul.f32 %v754_v32, %v822_v52  ;;  %v374_v45 = vmul.f32 %v756_v33, %v822_v52 }
 0x111   :  { %vm464_vm14 = vcmp.ge.f32.partialorder %v361_v28, 0.0  ;;  %vm465_vm15 = vcmp.ge.f32.partialorder %v437_v29, 0.0  ;;  %v496_v40 = vmul.f32 0.2, %v361_v28  ;;  %v497_v41 = vmul.f32 0.2, %v437_v29 }
 0x112   :  { %v512_v42 = vsel %vm448_vm12, %v353_v22, %v480_v36  ;;  %v513_v43 = vsel %vm449_vm13, %v429_v23, %v481_v37  ;;  %v306_v50 = vmul.f32 %v754_v32, %v824_v53  ;;  %v382_v51 = vmul.f32 %v756_v33, %v824_v53  ;;  %v892_v52 = vpop.f32.mrb[15].mxu0  ;;  %v894_v54 = vpop.f32.mrb[15].mxu1 }
 0x113   :  { %544 = vst [vmem:[%s1025_s3 + $0x30] sm:$0xff] %v512_v42  ;;  %545 = vst [vmem:[%s1025_s3 + $0x38] sm:$0xff] %v513_v43  ;;  %v528_v48 = vsel %vm464_vm14, %v361_v28, %v496_v40  ;;  %v529_v49 = vsel %vm465_vm15, %v437_v29, %v497_v41  ;;  %v318_v55 = vmul.f32 %v758_v34, %v830_v58 }
 0x114   :  { %560 = vst [vmem:[%s1025_s3 + $0xb0] sm:$0xff] %v528_v48  ;;  %561 = vst [vmem:[%s1025_s3 + $0xb8] sm:$0xff] %v529_v49  ;;  %v394_v56 = vmul.f32 %v760_v35, %v830_v58  ;;  %v326_v53 = vmul.f32 %v758_v34, %v832_v59  ;;  %v402_v57 = vmul.f32 %v760_v35, %v832_v59 }
 0x115   :  { %v299_v60 = vmul.f32 %v754_v32, %v834_v0  ;;  %v375_v61 = vmul.f32 %v756_v33, %v834_v0  ;;  %v307_v62 = vmul.f32 %v754_v32, %v836_v1  ;;  %v383_v63 = vmul.f32 %v756_v33, %v836_v1 }
 0x116   :  { %v334_v2 = vadd.f32 %v318_v55, %v298_v44  ;;  %v410_v58 = vadd.f32 %v394_v56, %v374_v45  ;;  %v342_v3 = vadd.f32 %v326_v53, %v306_v50  ;;  %v418_v4 = vadd.f32 %v402_v57, %v382_v51 }
 0x117   :  { %v319_v5 = vmul.f32 %v758_v34, %v842_v6  ;;  %v395_v59 = vmul.f32 %v760_v35, %v842_v6  ;;  %v327_v8 = vmul.f32 %v758_v34, %v844_v7  ;;  %v403_v0 = vmul.f32 %v760_v35, %v844_v7 }
 0x118   :  { %v354_v9 = vadd.f32 %v762_v38, %v334_v2  ;;  %v430_v1 = vadd.f32 %v764_v39, %v410_v58  ;;  %v362_v10 = vadd.f32 %v762_v38, %v342_v3  ;;  %v438_v11 = vadd.f32 %v764_v39, %v418_v4 }
 0x119   :  { %v335_v12 = vadd.f32 %v319_v5, %v299_v60  ;;  %v411_v13 = vadd.f32 %v395_v59, %v375_v61  ;;  %v343_v14 = vadd.f32 %v327_v8, %v307_v62  ;;  %v419_v15 = vadd.f32 %v403_v0, %v383_v63 }
 0x11a   :  { %vm450_vm0 = vcmp.ge.f32.partialorder %v354_v9, 0.0  ;;  %vm451_vm1 = vcmp.ge.f32.partialorder %v430_v1, 0.0  ;;  %v482_v6 = vmul.f32 0.2, %v354_v9  ;;  %v483_v16 = vmul.f32 0.2, %v430_v1 }
 0x11b   :  { %vm466_vm2 = vcmp.ge.f32.partialorder %v362_v10, 0.0  ;;  %vm467_vm3 = vcmp.ge.f32.partialorder %v438_v11, 0.0  ;;  %v498_v17 = vmul.f32 0.2, %v362_v10  ;;  %v499_v7 = vmul.f32 0.2, %v438_v11 }
 0x11c   :  { %v514_v18 = vsel %vm450_vm0, %v354_v9, %v482_v6  ;;  %v515_v19 = vsel %vm451_vm1, %v430_v1, %v483_v16  ;;  %v355_v20 = vadd.f32 %v762_v38, %v335_v12  ;;  %v431_v21 = vadd.f32 %v764_v39, %v411_v13 }
 0x11d   :  { %546 = vst [vmem:[%s1025_s3 + $0x40] sm:$0xff] %v514_v18  ;;  %547 = vst [vmem:[%s1025_s3 + $0x48] sm:$0xff] %v515_v19  ;;  %v530_v22 = vsel %vm466_vm2, %v362_v10, %v498_v17  ;;  %v531_v23 = vsel %vm467_vm3, %v438_v11, %v499_v7  ;;  %v363_v26 = vadd.f32 %v762_v38, %v343_v14 }
 0x11e   :  { %v439_v27 = vadd.f32 %v764_v39, %v419_v15  ;;  %562 = vst [vmem:[%s1025_s3 + $0xc0] sm:$0xff] %v530_v22  ;;  %563 = vst [vmem:[%s1025_s3 + $0xc8] sm:$0xff] %v531_v23  ;;  %vm452_vm4 = vcmp.ge.f32.partialorder %v355_v20, 0.0  ;;  %vm453_vm5 = vcmp.ge.f32.partialorder %v431_v21, 0.0  ;;  %v484_v28 = vmul.f32 0.2, %v355_v20 }
 0x11f   :  { %v485_v29 = vmul.f32 0.2, %v431_v21  ;;  %vm468_vm6 = vcmp.ge.f32.partialorder %v363_v26, 0.0  ;;  %v500_v36 = vmul.f32 0.2, %v363_v26  ;;  %v300_v42 = vmul.f32 %v754_v32, %v852_v24 }
 0x120   :  { %vm469_vm7 = vcmp.ge.f32.partialorder %v439_v27, 0.0  ;;  %v501_v37 = vmul.f32 0.2, %v439_v27  ;;  %v516_v40 = vsel %vm452_vm4, %v355_v20, %v484_v28  ;;  %v376_v43 = vmul.f32 %v756_v33, %v852_v24 }
 0x121   :  { %v517_v41 = vsel %vm453_vm5, %v431_v21, %v485_v29  ;;  %548 = vst [vmem:[%s1025_s3 + $0x50] sm:$0xff] %v516_v40  ;;  %v532_v44 = vsel %vm468_vm6, %v363_v26, %v500_v36  ;;  %v308_v48 = vmul.f32 %v754_v32, %v854_v25  ;;  %v384_v49 = vmul.f32 %v756_v33, %v854_v25 }
 0x122   :  { %549 = vst [vmem:[%s1025_s3 + $0x58] sm:$0xff] %v517_v41  ;;  %v533_v45 = vsel %vm469_vm7, %v439_v27, %v501_v37  ;;  %564 = vst [vmem:[%s1025_s3 + $0xd0] sm:$0xff] %v532_v44  ;;  %v320_v24 = vmul.f32 %v758_v34, %v864_v30  ;;  %v396_v50 = vmul.f32 %v760_v35, %v864_v30 }
 0x123   :  { %565 = vst [vmem:[%s1025_s3 + $0xd8] sm:$0xff] %v533_v45  ;;  %v328_v51 = vmul.f32 %v758_v34, %v866_v31  ;;  %v404_v25 = vmul.f32 %v760_v35, %v866_v31  ;;  %v301_v55 = vmul.f32 %v754_v32, %v878_v46  ;;  %v377_v56 = vmul.f32 %v756_v33, %v878_v46 }
 0x124   :  { %v309_v53 = vmul.f32 %v754_v32, %v880_v47  ;;  %v385_v57 = vmul.f32 %v756_v33, %v880_v47  ;;  %v336_v60 = vadd.f32 %v320_v24, %v300_v42  ;;  %v412_v30 = vadd.f32 %v396_v50, %v376_v43 }
 0x125   :  { %v344_v61 = vadd.f32 %v328_v51, %v308_v48  ;;  %v420_v62 = vadd.f32 %v404_v25, %v384_v49  ;;  %v321_v63 = vmul.f32 %v758_v34, %v892_v52  ;;  %v397_v31 = vmul.f32 %v760_v35, %v892_v52 }
 0x126   :  { %v329_v2 = vmul.f32 %v758_v34, %v894_v54  ;;  %v405_v46 = vmul.f32 %v760_v35, %v894_v54  ;;  %v356_v32 = vadd.f32 %v762_v38, %v336_v60  ;;  %v432_v33 = vadd.f32 %v764_v39, %v412_v30 }
 0x127   :  { %v364_v47 = vadd.f32 %v762_v38, %v344_v61  ;;  %v440_v58 = vadd.f32 %v764_v39, %v420_v62  ;;  %v337_v3 = vadd.f32 %v321_v63, %v301_v55  ;;  %v413_v4 = vadd.f32 %v397_v31, %v377_v56 }
 0x128   :  { %v345_v5 = vadd.f32 %v329_v2, %v309_v53  ;;  %v421_v59 = vadd.f32 %v405_v46, %v385_v57  ;;  %vm454_vm8 = vcmp.ge.f32.partialorder %v356_v32, 0.0  ;;  %vm455_vm9 = vcmp.ge.f32.partialorder %v432_v33, 0.0 }
 0x129   :  { %v486_v52 = vmul.f32 0.2, %v356_v32  ;;  %v487_v8 = vmul.f32 0.2, %v432_v33  ;;  %vm470_vm10 = vcmp.ge.f32.partialorder %v364_v47, 0.0  ;;  %vm471_vm11 = vcmp.ge.f32.partialorder %v440_v58, 0.0 }
 0x12a   :  { %v502_v34 = vmul.f32 0.2, %v364_v47  ;;  %v503_v35 = vmul.f32 0.2, %v440_v58  ;;  %v357_v9 = vadd.f32 %v762_v38, %v337_v3  ;;  %v433_v1 = vadd.f32 %v764_v39, %v413_v4 }
 0x12b   :  { %v518_v54 = vsel %vm454_vm8, %v356_v32, %v486_v52  ;;  %v519_v0 = vsel %vm455_vm9, %v432_v33, %v487_v8  ;;  %v365_v12 = vadd.f32 %v762_v38, %v345_v5  ;;  %v441_v13 = vadd.f32 %v764_v39, %v421_v59 }
 0x12c   :  { %550 = vst [vmem:[%s1025_s3 + $0x60] sm:$0xff] %v518_v54  ;;  %551 = vst [vmem:[%s1025_s3 + $0x68] sm:$0xff] %v519_v0  ;;  %v534_v10 = vsel %vm470_vm10, %v364_v47, %v502_v34  ;;  %v535_v11 = vsel %vm471_vm11, %v440_v58, %v503_v35  ;;  %vm456_vm12 = vcmp.ge.f32.partialorder %v357_v9, 0.0  ;;  %vm457_vm13 = vcmp.ge.f32.partialorder %v433_v1, 0.0 }
 0x12d   :  { %566 = vst [vmem:[%s1025_s3 + $0xe0] sm:$0xff] %v534_v10  ;;  %567 = vst [vmem:[%s1025_s3 + $0xe8] sm:$0xff] %v535_v11  ;;  %v488_v14 = vmul.f32 0.2, %v357_v9  ;;  %v489_v15 = vmul.f32 0.2, %v433_v1 }
 0x12e   :  { %vm472_vm14 = vcmp.ge.f32.partialorder %v365_v12, 0.0  ;;  %vm473_vm15 = vcmp.ge.f32.partialorder %v441_v13, 0.0  ;;  %v504_v6 = vmul.f32 0.2, %v365_v12  ;;  %v505_v16 = vmul.f32 0.2, %v441_v13 }
 0x12f   :  { %v520_v17 = vsel %vm456_vm12, %v357_v9, %v488_v14  ;;  %v521_v38 = vsel %vm457_vm13, %v433_v1, %v489_v15 }
 0x130   :  { %552 = vst [vmem:[%s1025_s3 + $0x70] sm:$0xff] %v520_v17  ;;  %553 = vst [vmem:[%s1025_s3 + $0x78] sm:$0xff] %v521_v38  ;;  %v536_v39 = vsel %vm472_vm14, %v365_v12, %v504_v6  ;;  %v537_v7 = vsel %vm473_vm15, %v441_v13, %v505_v16 }
 0x131   :  { %568 = vst [vmem:[%s1025_s3 + $0xf0] sm:$0xff] %v536_v39  ;;  %569 = vst [vmem:[%s1025_s3 + $0xf8] sm:$0xff] %v537_v7 }

</bundles_post_ra>
